<compile_context>
chip_gen: v5e
topology: v5e:2x2
jax: 0.10.0
libtpu: 0.0.40
codegen_flags: <defaults>
</compile_context>

<pallas_src>
import functools

import jax
import jax.numpy as jnp
from jax import lax
from jax.experimental import pallas as pl
from jax.experimental.pallas import tpu as pltpu

_LANE = 128


# ---------------------------------------------------------------------------
# Kernels
# ---------------------------------------------------------------------------

def _mm_kernel(x_ref, w_ref, o_ref):
    # 1x1 conv tile: [TM, C_in] @ [C_in, C_out] -> [TM, C_out] (f32 accumulate)
    o_ref[...] = jnp.dot(x_ref[...], w_ref[...], preferred_element_type=jnp.float32)


def _mm_add_kernel(x_ref, w_ref, r_ref, o_ref):
    # 1x1 conv tile with fused residual add (top-down pathway: conv(c_k) + up(prev))
    o_ref[...] = (
        jnp.dot(x_ref[...], w_ref[...], preferred_element_type=jnp.float32)
        + r_ref[...]
    )


def _conv3x3_kernel(x_ref, w_ref, o_ref, *, w_pad):
    """3x3 conv (padding=1), one spatially-padded, row-flattened image per grid step.

    x_ref: [S_pad, C]       bf16  padded image, (h, w) flattened row-major
    w_ref: [9, C, Co_pad]   bf16  taps ordered kh*3+kw
    o_ref: [P_out, Co_pad]  f32   P_out = H*(W+2) over-computed rows
                                  (invalid columns are sliced off in the wrapper)
    """
    p_out = o_ref.shape[0]
    acc = jnp.zeros(o_ref.shape, jnp.float32)
    for kh in range(3):
        for kw in range(3):
            d = kh * w_pad + kw                       # static row offset of this tap
            lhs = x_ref[pl.ds(d, p_out), :]           # contiguous row slice, no reshape
            acc = acc + jnp.dot(lhs, w_ref[kh * 3 + kw],
                                preferred_element_type=jnp.float32)
    o_ref[...] = acc


# ---------------------------------------------------------------------------
# Wrappers
# ---------------------------------------------------------------------------

def _pick_tm(m, target=256):
    for t in (target, 128, 64, 32, 16, 8):
        if t <= m and m % t == 0:
            return t
    return m


def conv1x1_nhwc(x_nhwc, w_oihw, residual=None):
    """1x1 conv, bias=False, as an M-tiled matmul. Optionally fuses `+ residual`."""
    n, h, w, c_in = x_nhwc.shape
    c_out = w_oihw.shape[0]
    w_io = w_oihw.reshape(c_out, c_in).T                       # [C_in, C_out]

    m = n * h * w
    tm = _pick_tm(m)

    x2d = x_nhwc.reshape(m, c_in).astype(jnp.bfloat16)
    w2d = w_io.astype(jnp.bfloat16)

    in_specs = [
        pl.BlockSpec((tm, c_in), lambda i: (i, 0)),
        pl.BlockSpec((c_in, c_out), lambda i: (0, 0)),         # resident weights
    ]
    args = [x2d, w2d]
    kernel = _mm_kernel
    bytes_accessed = x2d.size * 2 + w2d.size * 2 + m * c_out * 4
    if residual is not None:
        r2d = residual.reshape(m, c_out).astype(jnp.float32)
        in_specs.append(pl.BlockSpec((tm, c_out), lambda i: (i, 0)))
        args.append(r2d)
        kernel = _mm_add_kernel
        bytes_accessed += r2d.size * 4

    out = pl.pallas_call(
        kernel,
        out_shape=jax.ShapeDtypeStruct((m, c_out), jnp.float32),
        grid=(m // tm,),
        in_specs=in_specs,
        out_specs=pl.BlockSpec((tm, c_out), lambda i: (i, 0)),
        compiler_params=pltpu.CompilerParams(dimension_semantics=("parallel",)),
        cost_estimate=pl.CostEstimate(flops=2 * m * c_in * c_out,
                                      transcendentals=0,
                                      bytes_accessed=bytes_accessed),
    )(*args)
    return out.reshape(n, h, w, c_out)


def conv3x3_nhwc(x_nhwc, w_oihw):
    """3x3 conv, stride 1, padding 1, bias=False. Returns NHWC f32."""
    n, h, w, c_in = x_nhwc.shape
    c_out = w_oihw.shape[0]
    c_out_p = ((c_out + _LANE - 1) // _LANE) * _LANE           # lane-dense output

    w_pad = w + 2
    p_out = h * w_pad                       # over-computed rows (extra cols discarded)
    s = (h + 2) * w_pad
    s_pad = p_out + 2 * w_pad + 2           # rows so every tap slice stays in range

    xp = jnp.pad(x_nhwc, ((0, 0), (1, 1), (1, 1), (0, 0)))
    x_flat = xp.reshape(n, s, c_in)
    x_flat = jnp.pad(x_flat, ((0, 0), (0, s_pad - s), (0, 0))).astype(jnp.bfloat16)

    # OIHW -> [9, C_in, C_out_p], taps ordered kh*3+kw, zero-padded output channels.
    wt = jnp.transpose(w_oihw, (2, 3, 1, 0)).reshape(9, c_in, c_out)
    wt = jnp.pad(wt, ((0, 0), (0, 0), (0, c_out_p - c_out))).astype(jnp.bfloat16)

    # TODO(synk): for large H*W, tile the flattened-row axis with a halo
    # (manual DMA double-buffering) instead of one whole image per grid step.
    out = pl.pallas_call(
        functools.partial(_conv3x3_kernel, w_pad=w_pad),
        out_shape=jax.ShapeDtypeStruct((n, p_out, c_out_p), jnp.float32),
        grid=(n,),
        in_specs=[
            pl.BlockSpec((None, s_pad, c_in), lambda i: (i, 0, 0)),
            pl.BlockSpec((9, c_in, c_out_p), lambda i: (0, 0, 0)),  # resident weights
        ],
        out_specs=pl.BlockSpec((None, p_out, c_out_p), lambda i: (i, 0, 0)),
        compiler_params=pltpu.CompilerParams(dimension_semantics=("parallel",)),
        cost_estimate=pl.CostEstimate(
            flops=2 * n * p_out * c_in * c_out_p * 9,
            transcendentals=0,
            bytes_accessed=x_flat.size * 2 + wt.size * 2 + n * p_out * c_out_p * 4),
    )(x_flat, wt)

    return out.reshape(n, h, w_pad, c_out_p)[:, :, :w, :c_out]


def upsample_nearest_nhwc(x, s):
    n, h, w, c = x.shape
    x = jnp.broadcast_to(x[:, :, None, :, None, :], (n, h, s, w, s, c))
    return x.reshape(n, h * s, w * s, c)


def extractor_forward(features, params):
    """Pallas forward of Extractor. NCHW features in, NCHW fuse map out."""
    c2, c3, c4, c5 = [jnp.transpose(f, (0, 2, 3, 1)) for f in features]   # -> NHWC

    in5 = conv1x1_nhwc(c5, params["in5"])
    out4 = conv1x1_nhwc(c4, params["in4"], residual=upsample_nearest_nhwc(in5, 2))
    out3 = conv1x1_nhwc(c3, params["in3"], residual=upsample_nearest_nhwc(out4, 2))
    out2 = conv1x1_nhwc(c2, params["in2"], residual=upsample_nearest_nhwc(out3, 2))

    p5 = upsample_nearest_nhwc(conv3x3_nhwc(in5, params["out5"]), 8)
    p4 = upsample_nearest_nhwc(conv3x3_nhwc(out4, params["out4"]), 4)
    p3 = upsample_nearest_nhwc(conv3x3_nhwc(out3, params["out3"]), 2)
    p2 = conv3x3_nhwc(out2, params["out2"])

    fuse = jnp.concatenate([p5, p4, p3, p2], axis=-1)   # channel concat
    return jnp.transpose(fuse, (0, 3, 1, 2))            # -> NCHW


# ---------------------------------------------------------------------------
# Pure-JAX reference (mirrors the bf16-MXU-input / f32-accumulate policy so the
# comparison isolates kernel correctness; the PyTorch module itself is f32).
# ---------------------------------------------------------------------------

def _conv_ref(x, w_oihw, padding):
    return lax.conv_general_dilated(
        x.astype(jnp.bfloat16), w_oihw.astype(jnp.bfloat16),
        window_strides=(1, 1),
        padding=((padding, padding), (padding, padding)),
        dimension_numbers=("NCHW", "OIHW", "NCHW"),
        preferred_element_type=jnp.float32)


def _up_ref(x, s):
    n, c, h, w = x.shape
    x = jnp.broadcast_to(x[:, :, :, None, :, None], (n, c, h, s, w, s))
    return x.reshape(n, c, h * s, w * s)


def extractor_reference(features, params):
    c2, c3, c4, c5 = features
    in5 = _conv_ref(c5, params["in5"], 0)
    in4 = _conv_ref(c4, params["in4"], 0)
    in3 = _conv_ref(c3, params["in3"], 0)
    in2 = _conv_ref(c2, params["in2"], 0)
    out4 = _up_ref(in5, 2) + in4
    out3 = _up_ref(out4, 2) + in3
    out2 = _up_ref(out3, 2) + in2
    p5 = _up_ref(_conv_ref(in5, params["out5"], 1), 8)
    p4 = _up_ref(_conv_ref(out4, params["out4"], 1), 4)
    p3 = _up_ref(_conv_ref(out3, params["out3"], 1), 2)
    p2 = _conv_ref(out2, params["out2"], 1)
    return jnp.concatenate([p5, p4, p3, p2], axis=1)


# ---------------------------------------------------------------------------
# Main
# ---------------------------------------------------------------------------

if __name__ == "__main__":
    # Extractor(in_channels=[64, 128, 256, 512], inner_channels=256, bias=False)
    in_channels = [64, 128, 256, 512]
    inner = 256
    n = 2
    h2 = w2 = 16          # c2 spatial; c3/c4/c5 are 8/4/2

    key = jax.random.PRNGKey(0)
    keys = jax.random.split(key, 12)

    def feat(k, c, s):
        return jax.random.normal(k, (n, c, s, s), dtype=jnp.float32)

    c2 = feat(keys[0], in_channels[0], 16)
    c3 = feat(keys[1], in_channels[1], 8)
    c4 = feat(keys[2], in_channels[2], 4)
    c5 = feat(keys[3], in_channels[3], 2)
    features = (c2, c3, c4, c5)

    def wconv(k, co, ci, kh, kw):
        fan_in = ci * kh * kw
        return jax.random.normal(k, (co, ci, kh, kw), dtype=jnp.float32) / jnp.sqrt(
            jnp.float32(fan_in))

    params = {
        "in5": wconv(keys[4], inner, in_channels[3], 1, 1),
        "in4": wconv(keys[5], inner, in_channels[2], 1, 1),
        "in3": wconv(keys[6], inner, in_channels[1], 1, 1),
        "in2": wconv(keys[7], inner, in_channels[0], 1, 1),
        "out5": wconv(keys[8], inner // 4, inner, 3, 3),
        "out4": wconv(keys[9], inner // 4, inner, 3, 3),
        "out3": wconv(keys[10], inner // 4, inner, 3, 3),
        "out2": wconv(keys[11], inner // 4, inner, 3, 3),
    }

    out = jax.block_until_ready(extractor_forward(features, params))
    ref = jax.block_until_ready(extractor_reference(features, params))

    assert out.shape == (n, inner, h2, w2), out.shape
    max_err = float(jnp.max(jnp.abs(out - ref)))
    assert jnp.allclose(out, ref, atol=1e-2, rtol=1e-2), f"mismatch, max err {max_err}"

    print("KERNEL_OK")
</pallas_src>

<mosaic_0001>
module attributes {stable_mosaic.version = 11 : i64} {
  func.func @_mm_kernel(%arg0: i32, %arg1: memref<8x512xbf16, #tpu.memory_space<vmem>>, %arg2: memref<512x256xbf16, #tpu.memory_space<vmem>>, %arg3: memref<8x256xf32, #tpu.memory_space<vmem>>) attributes {dimension_semantics = [#tpu.dimension_semantics<parallel>], iteration_bounds = array<i64: 1>, scalar_prefetch = 0 : i64, scratch_operands = 0 : i64, tpu.core_type = #tpu.core_type<tc>, window_params = [{transform_indices = @transform_0, window_bounds = array<i64: 8, 512>}, {pipeline_mode = #tpu.pipeline_mode<synchronous>, transform_indices = @transform_1, window_bounds = array<i64: 512, 256>}, {transform_indices = @transform_2, window_bounds = array<i64: 8, 256>}]} {
    %c0 = arith.constant 0 : index
    %c0_0 = arith.constant 0 : index
    %0 = vector.load %arg1[%c0, %c0_0] : memref<8x512xbf16, #tpu.memory_space<vmem>>, vector<8x512xbf16>
    %c0_1 = arith.constant 0 : index
    %c0_2 = arith.constant 0 : index
    %1 = vector.load %arg2[%c0_1, %c0_2] : memref<512x256xbf16, #tpu.memory_space<vmem>>, vector<512x256xbf16>
    %cst = arith.constant dense<0.000000e+00> : vector<8x256xf32>
    %2 = tpu.matmul %0, %1, %cst {dimension_numbers = #tpu.dot_dimension_numbers<[1], [0], [0], [1], [0, 0, 1, 1], [], []>} : vector<8x512xbf16>, vector<512x256xbf16>, vector<8x256xf32> -> vector<8x256xf32>
    %c0_3 = arith.constant 0 : index
    %c0_4 = arith.constant 0 : index
    %3 = vector.load %arg3[%c0_3, %c0_4] : memref<8x256xf32, #tpu.memory_space<vmem>>, vector<8x256xf32>
    tpu.vector_store %arg3[%c0_3, %c0_4], %2 {strides = array<i32>} : memref<8x256xf32, #tpu.memory_space<vmem>>, vector<8x256xf32>,
    return
  }
  func.func @transform_0(%arg0: i32) -> (i32, i32) {
    %c0_i32 = arith.constant 0 : i32
    %c0_i32_0 = arith.constant 0 : i32
    return %arg0, %c0_i32 : i32, i32
  }
  func.func @transform_1(%arg0: i32) -> (i32, i32) {
    %c0_i32 = arith.constant 0 : i32
    %c0_i32_0 = arith.constant 0 : i32
    %c0_i32_1 = arith.constant 0 : i32
    return %c0_i32, %c0_i32_0 : i32, i32
  }
  func.func @transform_2(%arg0: i32) -> (i32, i32) {
    %c0_i32 = arith.constant 0 : i32
    %c0_i32_0 = arith.constant 0 : i32
    return %arg0, %c0_i32 : i32, i32
  }
}

</mosaic_0001>

<bundles_post_ra>
// kernel: tpu_custom_call.1
= control target key start
LH: loop header
LB: loop body
LE: loop exit
PB: predicated region body
PF: predicated region fallthrough
CT: control target
= control target key end

     0   :  { %7 = vsyncpa [#allocation3], 0  ;;  %s1014_s0 = inlined_call_operand.hbm [shape: bf16[8,512], index: 0, kind: input, shape index: {}]   ;;  %s1015_s1 = inlined_call_operand.hbm [shape: bf16[512,256], index: 1, kind: input, shape index: {}]   ;;  %s1016_s2 = inlined_call_operand.hbm [shape: f32[8,256], index: 2, kind: output, shape index: {}]  }
   0x1   :  { %8 = vsyncpa [#allocation6], 0 }
   0x2   :  { %9 = vsyncpa [#allocation4], 0  ;;  %s15_s11 = sshll.u32 %s1014_s0, 4  ;;  %s969_s12 = smov [#allocation2]   ;;  %s16_s11 = int_to_ptr.hbm [resolvable:$true] %s15_s11 }
   0x3   :  { %s17_s13 = sshll.u32 %s969_s12, 4  ;;  %s25_s16 = sshll.u32 %s1015_s1, 4  ;;  %s18_s13 = int_to_ptr.vmem [resolvable:$true] %s17_s13  ;;  %s26_s16 = int_to_ptr.hbm [resolvable:$true] %s25_s16 }
   0x4   :  { %20 = dma.hbm_to_vmem [thread:$0]  %s16_s11, 256, %s18_s13, [#allocation3]  }
   0x5   :  { %s970_s17 = smov [#allocation5]   ;;  %s971_s19 = smov 128  }
   0x6   :  { %s27_s18 = sshll.u32 %s970_s17, 4  ;;  %s972_s20 = smov 8   ;;  %s28_s18 = int_to_ptr.vmem [resolvable:$true] %s27_s18 }
   0x7   :  { %33 = dma.hbm_to_vmem [thread:$0]  %s26_s16, 8192, %s28_s18, [#allocation6], %s971_s19, %s971_s19, %s972_s20  }
   0x8   :  { %963 = dma.done.wait [#allocation3], 256  }
   0x9   :  { %964 = vsyncadd [#allocation3], 4294967040 }
   0xa   :  { %965 = dma.done.wait [#allocation6], 8192  }
   0xb   :  { %966 = vsyncadd [#allocation6], 4294959104  ;;  %v624_v0 = vld [vmem:[#allocation5 + $0x70] sm:$0xf]  ;;  %v837_v1 = vld [vmem:[#allocation5 + $0x74] sm:$0xf0] }
   0xc   :  { %v688_v2 = vld [vmem:[#allocation5 + $0xf0] sm:$0xf]  ;;  %v625_v3 = vor.u32 %v837_v1, %v624_v0  ;;  %v853_v4 = vld [vmem:[#allocation5 + $0xf4] sm:$0xf0]  ;;  %v616_v11 = vld [vmem:[#allocation5 + $0x60] sm:$0xf] }
   0xd   :  { %v752_v5 = vld [vmem:[#allocation5 + $0x170] sm:$0xf]  ;;  %v869_v6 = vld [vmem:[#allocation5 + $0x174] sm:$0xf0]  ;;  %v689_v7 = vor.u32 %v853_v4, %v688_v2  ;;  %v835_v13 = vld [vmem:[#allocation5 + $0x64] sm:$0xf0] }
   0xe   :  { %v753_v8 = vor.u32 %v869_v6, %v752_v5  ;;  %v816_v9 = vld [vmem:[#allocation5 + $0x1f0] sm:$0xf]  ;;  %v885_v10 = vld [vmem:[#allocation5 + $0x1f4] sm:$0xf0]  ;;  %442 = vmatpush.bf16.msra.mxu0 %v625_v3  ;;  %v680_v14 = vld [vmem:[#allocation5 + $0xe0] sm:$0xf]  ;;  %v617_v16 = vor.u32 %v835_v13, %v616_v11 }
   0xf   :  { %v817_v12 = vor.u32 %v885_v10, %v816_v9  ;;  %v851_v15 = vld [vmem:[#allocation5 + $0xe4] sm:$0xf0]  ;;  %455 = vmatpush.bf16.msra.mxu1 %v689_v7  ;;  %v744_v18 = vld [vmem:[#allocation5 + $0x160] sm:$0xf]  ;;  %v608_v23 = vld [vmem:[#allocation5 + $0x50] sm:$0xf] }
  0x10   :  { %468 = vmatpush.bf16.msra.mxu2 %v753_v8  ;;  %v681_v17 = vor.u32 %v851_v15, %v680_v14  ;;  %v867_v19 = vld [vmem:[#allocation5 + $0x164] sm:$0xf0]  ;;  %v808_v20 = vld [vmem:[#allocation5 + $0x1e0] sm:$0xf]  ;;  %v833_v24 = vld [vmem:[#allocation5 + $0x54] sm:$0xf0] }
  0x11   :  { %481 = vmatpush.bf16.msra.mxu3 %v817_v12  ;;  %v745_v21 = vor.u32 %v867_v19, %v744_v18  ;;  %v883_v22 = vld [vmem:[#allocation5 + $0x1e4] sm:$0xf0]  ;;  %v672_v26 = vld [vmem:[#allocation5 + $0xd0] sm:$0xf]  ;;  %v849_v27 = vld [vmem:[#allocation5 + $0xd4] sm:$0xf0]  ;;  %v609_v29 = vor.u32 %v833_v24, %v608_v23 }
  0x12   :  { %v809_v25 = vor.u32 %v883_v22, %v808_v20  ;;  %v736_v28 = vld [vmem:[#allocation5 + $0x150] sm:$0xf]  ;;  %443 = vmatpush.bf16.msra.mxu0 %v617_v16  ;;  %v865_v30 = vld [vmem:[#allocation5 + $0x154] sm:$0xf0]  ;;  %v673_v33 = vor.u32 %v849_v27, %v672_v26  ;;  %v600_v35 = vld [vmem:[#allocation5 + $0x40] sm:$0xf] }
  0x13   :  { %v800_v31 = vld [vmem:[#allocation5 + $0x1d0] sm:$0xf]  ;;  %v881_v32 = vld [vmem:[#allocation5 + $0x1d4] sm:$0xf0]  ;;  %456 = vmatpush.bf16.msra.mxu1 %v681_v17  ;;  %v737_v34 = vor.u32 %v865_v30, %v736_v28  ;;  %v831_v36 = vld [vmem:[#allocation5 + $0x44] sm:$0xf0] }
  0x14   :  { %469 = vmatpush.bf16.msra.mxu2 %v745_v21  ;;  %v664_v37 = vld [vmem:[#allocation5 + $0xc0] sm:$0xf]  ;;  %v801_v38 = vor.u32 %v881_v32, %v800_v31  ;;  %v847_v39 = vld [vmem:[#allocation5 + $0xc4] sm:$0xf0]  ;;  %v601_v44 = vor.u32 %v831_v36, %v600_v35  ;;  %v592_v47 = vld [vmem:[#allocation5 + $0x30] sm:$0xf] }
  0x15   :  { %482 = vmatpush.bf16.msra.mxu3 %v809_v25  ;;  %v728_v40 = vld [vmem:[#allocation5 + $0x140] sm:$0xf]  ;;  %v863_v41 = vld [vmem:[#allocation5 + $0x144] sm:$0xf0]  ;;  %v665_v45 = vor.u32 %v847_v39, %v664_v37  ;;  %v829_v48 = vld [vmem:[#allocation5 + $0x34] sm:$0xf0] }
  0x16   :  { %v792_v42 = vld [vmem:[#allocation5 + $0x1c0] sm:$0xf]  ;;  %v879_v43 = vld [vmem:[#allocation5 + $0x1c4] sm:$0xf0]  ;;  %444 = vmatpush.bf16.msra.mxu0 %v609_v29  ;;  %v729_v46 = vor.u32 %v863_v41, %v728_v40  ;;  %v656_v49 = vld [vmem:[#allocation5 + $0xb0] sm:$0xf]  ;;  %v593_v56 = vor.u32 %v829_v48, %v592_v47 }
  0x17   :  { %457 = vmatpush.bf16.msra.mxu1 %v673_v33  ;;  %v793_v50 = vor.u32 %v879_v43, %v792_v42  ;;  %v845_v51 = vld [vmem:[#allocation5 + $0xb4] sm:$0xf0]  ;;  %v720_v52 = vld [vmem:[#allocation5 + $0x130] sm:$0xf]  ;;  %v584_v59 = vld [vmem:[#allocation5 + $0x20] sm:$0xf] }
  0x18   :  { %470 = vmatpush.bf16.msra.mxu2 %v737_v34  ;;  %v861_v53 = vld [vmem:[#allocation5 + $0x134] sm:$0xf0]  ;;  %v784_v54 = vld [vmem:[#allocation5 + $0x1b0] sm:$0xf]  ;;  %v657_v57 = vor.u32 %v845_v51, %v656_v49  ;;  %v827_v60 = vld [vmem:[#allocation5 + $0x24] sm:$0xf0] }
  0x19   :  { %483 = vmatpush.bf16.msra.mxu3 %v801_v38  ;;  %v877_v55 = vld [vmem:[#allocation5 + $0x1b4] sm:$0xf0]  ;;  %v721_v58 = vor.u32 %v861_v53, %v720_v52  ;;  %v648_v61 = vld [vmem:[#allocation5 + $0xa0] sm:$0xf]  ;;  %v843_v63 = vld [vmem:[#allocation5 + $0xa4] sm:$0xf0]  ;;  %v585_v4 = vor.u32 %v827_v60, %v584_v59 }
  0x1a   :  { %445 = vmatpush.bf16.msra.mxu0 %v601_v44  ;;  %v785_v62 = vor.u32 %v877_v55, %v784_v54  ;;  %v712_v0 = vld [vmem:[#allocation5 + $0x120] sm:$0xf]  ;;  %v859_v1 = vld [vmem:[#allocation5 + $0x124] sm:$0xf0]  ;;  %v649_v5 = vor.u32 %v843_v63, %v648_v61  ;;  %v576_v7 = vld [vmem:[#allocation5 + $0x10] sm:$0xf] }
  0x1b   :  { %458 = vmatpush.bf16.msra.mxu1 %v665_v45  ;;  %v776_v2 = vld [vmem:[#allocation5 + $0x1a0] sm:$0xf]  ;;  %v875_v3 = vld [vmem:[#allocation5 + $0x1a4] sm:$0xf0]  ;;  %v713_v6 = vor.u32 %v859_v1, %v712_v0  ;;  %v825_v8 = vld [vmem:[#allocation5 + $0x14] sm:$0xf0] }
  0x1c   :  { %471 = vmatpush.bf16.msra.mxu2 %v729_v46  ;;  %v640_v9 = vld [vmem:[#allocation5 + $0x90] sm:$0xf]  ;;  %v777_v10 = vor.u32 %v875_v3, %v776_v2  ;;  %v841_v11 = vld [vmem:[#allocation5 + $0x94] sm:$0xf0]  ;;  %v577_v16 = vor.u32 %v825_v8, %v576_v7  ;;  %v568_v17 = vld [vmem:[#allocation5] sm:$0xf] }
  0x1d   :  { %484 = vmatpush.bf16.msra.mxu3 %v793_v50  ;;  %v704_v12 = vld [vmem:[#allocation5 + $0x110] sm:$0xf]  ;;  %v857_v13 = vld [vmem:[#allocation5 + $0x114] sm:$0xf0]  ;;  %v823_v18 = vld [vmem:[#allocation5 + $0x4] sm:$0xf0]  ;;  %v641_v20 = vor.u32 %v841_v11, %v640_v9 }
  0x1e   :  { %446 = vmatpush.bf16.msra.mxu0 %v593_v56  ;;  %v768_v14 = vld [vmem:[#allocation5 + $0x190] sm:$0xf]  ;;  %v873_v15 = vld [vmem:[#allocation5 + $0x194] sm:$0xf0]  ;;  %v632_v19 = vld [vmem:[#allocation5 + $0x80] sm:$0xf]  ;;  %v705_v21 = vor.u32 %v857_v13, %v704_v12  ;;  %v569_v32 = vor.u32 %v823_v18, %v568_v17 }
  0x1f   :  { %459 = vmatpush.bf16.msra.mxu1 %v657_v57  ;;  %v839_v22 = vld [vmem:[#allocation5 + $0x84] sm:$0xf0]  ;;  %v696_v23 = vld [vmem:[#allocation5 + $0x100] sm:$0xf]  ;;  %v769_v25 = vor.u32 %v873_v15, %v768_v14  ;;  %v836_v28 = vld [vmem:[#allocation5 + $0x74] sm:$0xf] }
  0x20   :  { %472 = vmatpush.bf16.msra.mxu2 %v721_v58  ;;  %v855_v24 = vld [vmem:[#allocation5 + $0x104] sm:$0xf0]  ;;  %v760_v26 = vld [vmem:[#allocation5 + $0x180] sm:$0xf]  ;;  %v626_v29 = vld [vmem:[#allocation5 + $0x78] sm:$0xf0]  ;;  %v633_v37 = vor.u32 %v839_v22, %v632_v19 }
  0x21   :  { %485 = vmatpush.bf16.msra.mxu3 %v785_v62  ;;  %v871_v27 = vld [vmem:[#allocation5 + $0x184] sm:$0xf0]  ;;  %v852_v30 = vld [vmem:[#allocation5 + $0xf4] sm:$0xf]  ;;  %v43_v31 = vld [vmem:[#allocation2 + $0x8] sm:$0xff]  ;;  %v697_v38 = vor.u32 %v855_v24, %v696_v23  ;;  %v629_v43 = vor.u32 %v836_v28, %v626_v29  ;;  %s973_s0 = smov [#allocation7]  }
  0x22   :  { %447 = vmatpush.bf16.msra.mxu0 %v585_v4  ;;  %v690_v33 = vld [vmem:[#allocation5 + $0xf8] sm:$0xf0]  ;;  %v868_v34 = vld [vmem:[#allocation5 + $0x174] sm:$0xf]  ;;  %v112_v36 = vunpack.c.l.b16 %v43_v31  ;;  %v113_v41 = vunpack.c.h.b16 %v43_v31  ;;  %v761_v42 = vor.u32 %v871_v27, %v760_v26  ;;  %v834_v46 = vld [vmem:[#allocation5 + $0x64] sm:$0xf] }
  0x23   :  { %460 = vmatpush.bf16.msra.mxu1 %v649_v5  ;;  %v754_v35 = vld [vmem:[#allocation5 + $0x178] sm:$0xf0]  ;;  %v884_v39 = vld [vmem:[#allocation5 + $0x1f4] sm:$0xf]  ;;  %v693_v44 = vor.u32 %v852_v30, %v690_v33  ;;  %v618_v47 = vld [vmem:[#allocation5 + $0x68] sm:$0xf0] }
  0x24   :  { %473 = vmatpush.bf16.msra.mxu2 %v713_v6  ;;  %v818_v40 = vld [vmem:[#allocation5 + $0x1f8] sm:$0xf0]  ;;  %v757_v45 = vor.u32 %v868_v34, %v754_v35  ;;  %v850_v48 = vld [vmem:[#allocation5 + $0xe4] sm:$0xf]  ;;  %v682_v50 = vld [vmem:[#allocation5 + $0xe8] sm:$0xf0]  ;;  %v995_v53 = vpack.c.b16 %v112_v36, %v112_v36  ;;  %v997_v56 = vpack.c.b16 %v113_v41, %v113_v41  ;;  %v621_v58 = vor.u32 %v834_v46, %v618_v47 }
  0x25   :  { %486 = vmatpush.bf16.msra.mxu3 %v777_v10  ;;  %v821_v49 = vor.u32 %v884_v39, %v818_v40  ;;  %v866_v51 = vld [vmem:[#allocation5 + $0x164] sm:$0xf]  ;;  %v746_v52 = vld [vmem:[#allocation5 + $0x168] sm:$0xf0]  ;;  %v42_v57 = vld [vmem:[#allocation2] sm:$0xff]  ;;  %v685_v61 = vor.u32 %v850_v48, %v682_v50  ;;  %s553_s1 = sshll.u32 %s973_s0, 4  ;;  %s554_s1 = int_to_ptr.vmem [resolvable:$true] %s553_s1 }
  0x26   :  { %448 = vmatpush.bf16.msra.mxu0 %v577_v16  ;;  %v882_v54 = vld [vmem:[#allocation5 + $0x1e4] sm:$0xf]  ;;  %v810_v55 = vld [vmem:[#allocation5 + $0x1e8] sm:$0xf0]  ;;  %v110_v59 = vunpack.c.l.b16 %v42_v57  ;;  %v111_v60 = vunpack.c.h.b16 %v42_v57  ;;  %v749_v62 = vor.u32 %v866_v51, %v746_v52  ;;  %v832_v63 = vld [vmem:[#allocation5 + $0x54] sm:$0xf] }
  0x27   :  { %461 = vmatpush.bf16.msra.mxu1 %v641_v20  ;;  %v610_v0 = vld [vmem:[#allocation5 + $0x58] sm:$0xf0]  ;;  %v848_v1 = vld [vmem:[#allocation5 + $0xd4] sm:$0xf]  ;;  %v813_v2 = vor.u32 %v882_v54, %v810_v55  ;;  %v830_v13 = vld [vmem:[#allocation5 + $0x44] sm:$0xf] }
  0x28   :  { %474 = vmatpush.bf16.msra.mxu2 %v705_v21  ;;  %v674_v3 = vld [vmem:[#allocation5 + $0xd8] sm:$0xf0]  ;;  %v864_v4 = vld [vmem:[#allocation5 + $0x154] sm:$0xf]  ;;  %v1000_v6 = vpack.c.b16 %v110_v59, %v110_v59  ;;  %v1002_v7 = vpack.c.b16 %v111_v60, %v111_v60  ;;  %v613_v10 = vor.u32 %v832_v63, %v610_v0  ;;  %v602_v14 = vld [vmem:[#allocation5 + $0x48] sm:$0xf0] }
  0x29   :  { %487 = vmatpush.bf16.msra.mxu3 %v769_v25  ;;  %v738_v5 = vld [vmem:[#allocation5 + $0x158] sm:$0xf0]  ;;  %v880_v8 = vld [vmem:[#allocation5 + $0x1d4] sm:$0xf]  ;;  %v677_v11 = vor.u32 %v848_v1, %v674_v3  ;;  %v846_v15 = vld [vmem:[#allocation5 + $0xc4] sm:$0xf]  ;;  %v605_v22 = vor.u32 %v830_v13, %v602_v14 }
  0x2a   :  { %449 = vmatpush.bf16.msra.mxu0 %v569_v32  ;;  %v802_v9 = vld [vmem:[#allocation5 + $0x1d8] sm:$0xf0]  ;;  %v741_v12 = vor.u32 %v864_v4, %v738_v5  ;;  %v666_v17 = vld [vmem:[#allocation5 + $0xc8] sm:$0xf0]  ;;  %v862_v18 = vld [vmem:[#allocation5 + $0x144] sm:$0xf] }
  0x2b   :  { %462 = vmatpush.bf16.msra.mxu1 %v633_v37  ;;  %v805_v16 = vor.u32 %v880_v8, %v802_v9  ;;  %v730_v19 = vld [vmem:[#allocation5 + $0x148] sm:$0xf0]  ;;  %v878_v20 = vld [vmem:[#allocation5 + $0x1c4] sm:$0xf]  ;;  %v669_v23 = vor.u32 %v846_v15, %v666_v17  ;;  %v828_v25 = vld [vmem:[#allocation5 + $0x34] sm:$0xf] }
  0x2c   :  { %475 = vmatpush.bf16.msra.mxu2 %v697_v38  ;;  %v794_v21 = vld [vmem:[#allocation5 + $0x1c8] sm:$0xf0]  ;;  %v733_v24 = vor.u32 %v862_v18, %v730_v19  ;;  %v594_v26 = vld [vmem:[#allocation5 + $0x38] sm:$0xf0]  ;;  %v844_v27 = vld [vmem:[#allocation5 + $0xb4] sm:$0xf] }
  0x2d   :  { %488 = vmatpush.bf16.msra.mxu3 %v761_v42  ;;  %450 = vmatmul.bf16.vlgmr.msra.gmra.mxu0 %v1000_v6  ;;  %v797_v28 = vor.u32 %v878_v20, %v794_v21  ;;  %v658_v29 = vld [vmem:[#allocation5 + $0xb8] sm:$0xf0]  ;;  %v860_v30 = vld [vmem:[#allocation5 + $0x134] sm:$0xf]  ;;  %v597_v34 = vor.u32 %v828_v25, %v594_v26  ;;  %v826_v37 = vld [vmem:[#allocation5 + $0x24] sm:$0xf] }
  0x2e   :  { %494 = vmatpush.bf16.msrb.mxu0 %v629_v43  ;;  %463 = vmatmul.bf16.vlgmr.msra.gmra.mxu1 %v1002_v7  ;;  %v722_v31 = vld [vmem:[#allocation5 + $0x138] sm:$0xf0]  ;;  %v876_v32 = vld [vmem:[#allocation5 + $0x1b4] sm:$0xf]  ;;  %v661_v35 = vor.u32 %v844_v27, %v658_v29  ;;  %v586_v38 = vld [vmem:[#allocation5 + $0x28] sm:$0xf0] }
  0x2f   :  { %507 = vmatpush.bf16.msrb.mxu1 %v693_v44  ;;  %476 = vmatmul.bf16.vlgmr.msra.gmra.mxu2 %v995_v53  ;;  %v786_v33 = vld [vmem:[#allocation5 + $0x1b8] sm:$0xf0]  ;;  %v725_v36 = vor.u32 %v860_v30, %v722_v31  ;;  %v842_v39 = vld [vmem:[#allocation5 + $0xa4] sm:$0xf]  ;;  %v650_v41 = vld [vmem:[#allocation5 + $0xa8] sm:$0xf0]  ;;  %v589_v46 = vor.u32 %v826_v37, %v586_v38 }
  0x30   :  { %520 = vmatpush.bf16.msrb.mxu2 %v757_v45  ;;  %489 = vmatmul.bf16.vlgmr.msra.gmra.mxu3 %v997_v56  ;;  %v789_v40 = vor.u32 %v876_v32, %v786_v33  ;;  %v858_v42 = vld [vmem:[#allocation5 + $0x124] sm:$0xf]  ;;  %v714_v43 = vld [vmem:[#allocation5 + $0x128] sm:$0xf0]  ;;  %v653_v47 = vor.u32 %v842_v39, %v650_v41  ;;  %v578_v50 = vld [vmem:[#allocation5 + $0x18] sm:$0xf0] }
  0x31   :  { %533 = vmatpush.bf16.msrb.mxu3 %v821_v49  ;;  %v874_v44 = vld [vmem:[#allocation5 + $0x1a4] sm:$0xf]  ;;  %v778_v45 = vld [vmem:[#allocation5 + $0x1a8] sm:$0xf0]  ;;  %v717_v48 = vor.u32 %v858_v42, %v714_v43  ;;  %v824_v49 = vld [vmem:[#allocation5 + $0x14] sm:$0xf] }
  0x32   :  { %495 = vmatpush.bf16.msrb.mxu0 %v621_v58  ;;  %v840_v51 = vld [vmem:[#allocation5 + $0x94] sm:$0xf]  ;;  %v781_v52 = vor.u32 %v874_v44, %v778_v45  ;;  %v642_v54 = vld [vmem:[#allocation5 + $0x98] sm:$0xf0]  ;;  %v581_v60 = vor.u32 %v824_v49, %v578_v50  ;;  %v822_v63 = vld [vmem:[#allocation5 + $0x4] sm:$0xf] }
  0x33   :  { %508 = vmatpush.bf16.msrb.mxu1 %v685_v61  ;;  %v856_v55 = vld [vmem:[#allocation5 + $0x114] sm:$0xf]  ;;  %v706_v57 = vld [vmem:[#allocation5 + $0x118] sm:$0xf0]  ;;  %v645_v61 = vor.u32 %v840_v51, %v642_v54  ;;  %v570_v0 = vld [vmem:[#allocation5 + $0x8] sm:$0xf0] }
  0x34   :  { %521 = vmatpush.bf16.msrb.mxu2 %v749_v62  ;;  %v872_v58 = vld [vmem:[#allocation5 + $0x194] sm:$0xf]  ;;  %v770_v59 = vld [vmem:[#allocation5 + $0x198] sm:$0xf0]  ;;  %v709_v62 = vor.u32 %v856_v55, %v706_v57  ;;  %v838_v1 = vld [vmem:[#allocation5 + $0x84] sm:$0xf] }
  0x35   :  { %534 = vmatpush.bf16.msrb.mxu3 %v813_v2  ;;  %v773_v2 = vor.u32 %v872_v58, %v770_v59  ;;  %v634_v3 = vld [vmem:[#allocation5 + $0x88] sm:$0xf0]  ;;  %v854_v4 = vld [vmem:[#allocation5 + $0x104] sm:$0xf]  ;;  %s555_s23 = sshll.u32 %s1016_s2, 4  ;;  %s556_s23 = int_to_ptr.hbm [resolvable:$true] %s555_s23 }
  0x36   :  { %496 = vmatpush.bf16.msrb.mxu0 %v613_v10  ;;  %v698_v5 = vld [vmem:[#allocation5 + $0x108] sm:$0xf0]  ;;  %v870_v8 = vld [vmem:[#allocation5 + $0x184] sm:$0xf]  ;;  %v573_v10 = vor.u32 %v822_v63, %v570_v0 }
  0x37   :  { %509 = vmatpush.bf16.msrb.mxu1 %v677_v11  ;;  %v762_v9 = vld [vmem:[#allocation5 + $0x188] sm:$0xf0]  ;;  %v637_v11 = vor.u32 %v838_v1, %v634_v3 }
  0x38   :  { %522 = vmatpush.bf16.msrb.mxu2 %v741_v12  ;;  %v701_v12 = vor.u32 %v854_v4, %v698_v5  ;;  %v765_v13 = vor.u32 %v870_v8, %v762_v9 }
  0x39   :  { %535 = vmatpush.bf16.msrb.mxu3 %v805_v16 }
  0x3a   :  { %497 = vmatpush.bf16.msrb.mxu0 %v605_v22 }
  0x3b   :  { %510 = vmatpush.bf16.msrb.mxu1 %v669_v23 }
  0x3c   :  { %523 = vmatpush.bf16.msrb.mxu2 %v733_v24 }
  0x3d   :  { %536 = vmatpush.bf16.msrb.mxu3 %v797_v28 }
  0x3e   :  { %498 = vmatpush.bf16.msrb.mxu0 %v597_v34 }
  0x3f   :  { %511 = vmatpush.bf16.msrb.mxu1 %v661_v35 }
  0x40   :  { %524 = vmatpush.bf16.msrb.mxu2 %v725_v36 }
  0x41   :  { %537 = vmatpush.bf16.msrb.mxu3 %v789_v40 }
  0x42   :  { %499 = vmatpush.bf16.msrb.mxu0 %v589_v46 }
  0x43   :  { %512 = vmatpush.bf16.msrb.mxu1 %v653_v47 }
  0x44   :  { %525 = vmatpush.bf16.msrb.mxu2 %v717_v48 }
  0x45   :  { %538 = vmatpush.bf16.msrb.mxu3 %v781_v52 }
  0x46   :  { %500 = vmatpush.bf16.msrb.mxu0 %v581_v60 }
  0x47   :  { %513 = vmatpush.bf16.msrb.mxu1 %v645_v61 }
  0x48   :  { %526 = vmatpush.bf16.msrb.mxu2 %v709_v62 }
  0x49   :  { %539 = vmatpush.bf16.msrb.mxu3 %v773_v2 }
  0x4a   :  { %501 = vmatpush.bf16.msrb.mxu0 %v573_v10 }
  0x4b   :  { %514 = vmatpush.bf16.msrb.mxu1 %v637_v11 }
  0x4c   :  { %527 = vmatpush.bf16.msrb.mxu2 %v701_v12 }
  0x4d   :  { %540 = vmatpush.bf16.msrb.mxu3 %v765_v13  ;;  %502 = vmatmul.bf16.vlgmr.msrb.gmra.mxu0 %v1000_v6 }
  0x4e   :  { %515 = vmatmul.bf16.vlgmr.msrb.gmra.mxu1 %v1002_v7 }
  0x4f   :  { %528 = vmatmul.bf16.vlgmr.msrb.gmra.mxu2 %v995_v53 }
  0x50   :  { %541 = vmatmul.bf16.vlgmr.msrb.gmra.mxu3 %v997_v56 }
  0xaa   :  { %v451_v15 = vpop.f32.mrf.mxu0 }
  0xab   :  { %v464_v14 = vpop.f32.mrf.mxu1 }
  0xac   :  { %v465_v16 = vadd.f32 %v464_v14, %v451_v15 }
  0xb2   :  { %v477_v17 = vpop.f32.mrf.mxu2  ;;  %v453_v22 = vpop.f32.mrf.mxu0 }
  0xb3   :  { %v478_v18 = vadd.f32 %v477_v17, %v465_v16  ;;  %v490_v19 = vpop.f32.mrf.mxu3  ;;  %v466_v21 = vpop.f32.mrf.mxu1 }
  0xb5   :  { %v491_v20 = vadd.f32 %v490_v19, %v478_v18 }
  0xb7   :  { %546 = vst [vmem:[#allocation7] sm:$0xff] %v491_v20 }
  0xba   :  { %v479_v23 = vpop.f32.mrf.mxu2 }
  0xbb   :  { %v492_v24 = vpop.f32.mrf.mxu3 }
  0xca   :  { %v503_v25 = vpop.f32.mrf.mxu0 }
  0xcb   :  { %v516_v6 = vpop.f32.mrf.mxu1 }
  0xcc   :  { %v517_v26 = vadd.f32 %v516_v6, %v503_v25 }
  0xd2   :  { %v529_v7 = vpop.f32.mrf.mxu2  ;;  %v505_v27 = vpop.f32.mrf.mxu0 }
  0xd3   :  { %v530_v53 = vadd.f32 %v529_v7, %v517_v26  ;;  %v542_v56 = vpop.f32.mrf.mxu3  ;;  %v518_v28 = vpop.f32.mrf.mxu1 }
  0xd5   :  { %v543_v29 = vadd.f32 %v542_v56, %v530_v53 }
  0xd7   :  { %547 = vst [vmem:[#allocation7 + $0x8] sm:$0xff] %v543_v29 }
  0xd8   :  { %558 = dma.vmem_to_hbm [thread:$0]  %s554_s1, 256, %s556_s23, [#allocation4]  }
  0xda   :  { %v531_v30 = vpop.f32.mrf.mxu2 }
  0xdb   :  { %v544_v31 = vpop.f32.mrf.mxu3 }
  0xdc   :  { %967 = dma.done.wait [#allocation4], 256  }
  0xdd   :  { %968 = vsyncadd [#allocation4], 4294967040 }
  0xde   :  { %563 = vsyncpa [#allocation3], 1 }
  0xdf   :  { %564 = vsyncpa [#allocation6], 1 }
  0xe0   :  { %565 = vsyncpa [#allocation4], 1 }

</bundles_post_ra>
